<compile_context>
chip_gen: v7x
topology: tpu7x:2x2x1
jax: 0.10.0
libtpu: 0.0.40
codegen_flags: <defaults>
</compile_context>

<pallas_src>
import jax
import jax.numpy as jnp
from jax.experimental import pallas as pl
from jax.experimental.pallas import tpu as pltpu


def _capsule_dropout_kernel(x_ref, f_ref, o_ref):
    # x_ref / o_ref: (TM, L) tile of the flattened (B*C, H*W) input/output;
    # each row is one (b, c) channel.
    # f_ref: (TM, 1) per-channel factor in f32: 0.0 (dropped) or 1/(1-p) (kept).
    o_ref[...] = x_ref[...] * f_ref[...].astype(o_ref.dtype)


def capsule_dropout_forward(x, p, seed, *, training=True,
                            target_buffer_bytes=2 << 20):
    """nn.Dropout2d forward. x: (B, C, H, W). Drops whole (b, c) channels."""
    if (not training) or p == 0.0:
        return x
    if p >= 1.0:
        return jnp.zeros_like(x)

    B, C, H, W = x.shape
    M, L = B * C, H * W
    keep_prob = 1.0 - float(p)

    # Per-(b, c)-channel keep/scale factor drawn with the standard JAX PRNG in
    # the wrapper: the dropout pattern is independent of tile size / grid
    # order / core count, and nothing TPU-PRNG-specific has to lower in the
    # kernel body.
    key = jax.random.PRNGKey(seed)
    keep = jax.random.bernoulli(key, keep_prob, (M, 1))
    factor = keep.astype(jnp.float32) * jnp.float32(1.0 / keep_prob)

    # Contiguous reshape (no HBM round trip): channels -> rows, spatial extent
    # -> lane dimension.
    x2 = x.reshape(M, L)

    # --- VMEM-budget-derived row tile -------------------------------------
    dtype_bytes = jnp.dtype(x.dtype).itemsize
    sublane = {4: 8, 2: 16, 1: 32}.get(dtype_bytes, 8)   # dtype-aware packing

    if M <= sublane:
        tm = M                                            # full-dim block
    else:
        tm_budget = max(
            sublane,
            (target_buffer_bytes // (L * dtype_bytes)) // sublane * sublane)
        # keep the grid length >= 2 so the "parallel" axis can actually shard
        # across v7x's two TensorCores
        tm_half = max(sublane, (pl.cdiv(M, 2) // sublane) * sublane)
        tm = min(tm_budget, tm_half)
    grid = (pl.cdiv(M, tm),)

    # Double-buffered in + out tiles plus the (tm, 1) factor tile (padded to a
    # full lane in VMEM) and some slack.  Explicit so v5e's 16 MiB scoped
    # default never rejects / down-buffers; capped below v7x's 32 MiB default.
    tile_bytes = tm * L * dtype_bytes
    factor_tile_bytes = tm * 128 * 4
    vmem_limit = int(min(max(2 * (2 * tile_bytes + factor_tile_bytes) + (4 << 20),
                             16 << 20),
                         30 << 20))

    out2 = pl.pallas_call(
        _capsule_dropout_kernel,
        out_shape=jax.ShapeDtypeStruct((M, L), x.dtype),
        grid_spec=pl.GridSpec(
            grid=grid,
            in_specs=[pl.BlockSpec((tm, L), lambda i: (i, 0)),
                      pl.BlockSpec((tm, 1), lambda i: (i, 0))],
            out_specs=pl.BlockSpec((tm, L), lambda i: (i, 0)),
        ),
        compiler_params=pltpu.CompilerParams(
            dimension_semantics=("parallel",),
            vmem_limit_bytes=vmem_limit,
        ),
    )(x2, factor)

    return out2.reshape(B, C, H, W)


if __name__ == "__main__":
    # Small shapes consistent with the capsule network usage:
    # (batch, capsule channels, spatial, spatial).
    B, C, H, W = 2, 4, 16, 16
    p = 0.5
    seed = 0

    key = jax.random.PRNGKey(0)
    x = jax.random.normal(key, (B, C, H, W), dtype=jnp.float32)

    out = capsule_dropout_forward(x, p, seed, training=True)
    out = jax.block_until_ready(out)
    assert out.shape == x.shape

    # --- structural verification of Dropout2d semantics ---
    # Every (b, c) channel must be either entirely zero (dropped) or exactly
    # the input channel scaled by 1/(1-p) (kept).
    scale = 1.0 / (1.0 - p)
    x2 = x.reshape(B * C, H * W)
    o2 = out.reshape(B * C, H * W)
    dropped = jnp.max(jnp.abs(o2), axis=1) < 1e-6
    kept = jnp.max(jnp.abs(o2 - x2 * scale), axis=1) < 1e-4
    assert bool(jnp.all(jnp.logical_or(dropped, kept)))

    # Eval mode and p == 0 are the identity (matches nn.Dropout2d).
    out_eval = jax.block_until_ready(
        capsule_dropout_forward(x, p, seed, training=False))
    assert jnp.allclose(out_eval, x)
    out_p0 = jax.block_until_ready(
        capsule_dropout_forward(x, 0.0, seed, training=True))
    assert jnp.allclose(out_p0, x)

    print("KERNEL_OK")
</pallas_src>

<mosaic_0001>
module attributes {stable_mosaic.version = 11 : i64} {
  func.func @_capsule_dropout_kernel(%arg0: i32, %arg1: memref<8x256xf32, #tpu.memory_space<vmem>>, %arg2: memref<8x1xf32, #tpu.memory_space<vmem>>, %arg3: memref<8x256xf32, #tpu.memory_space<vmem>>) attributes {dimension_semantics = [#tpu.dimension_semantics<parallel>], iteration_bounds = array<i64: 1>, scalar_prefetch = 0 : i64, scratch_operands = 0 : i64, tpu.core_type = #tpu.core_type<tc>, window_params = [{transform_indices = @transform_0, window_bounds = array<i64: 8, 256>}, {transform_indices = @transform_1, window_bounds = array<i64: 8, 1>}, {transform_indices = @transform_2, window_bounds = array<i64: 8, 256>}]} {
    %c0 = arith.constant 0 : index
    %c0_0 = arith.constant 0 : index
    %0 = vector.load %arg1[%c0, %c0_0] : memref<8x256xf32, #tpu.memory_space<vmem>>, vector<8x256xf32>
    %c0_1 = arith.constant 0 : index
    %c0_2 = arith.constant 0 : index
    %1 = vector.load %arg2[%c0_1, %c0_2] : memref<8x1xf32, #tpu.memory_space<vmem>>, vector<8x1xf32>
    %2 = vector.broadcast %1 : vector<8x1xf32> to vector<8x256xf32>
    %3 = arith.mulf %0, %2 : vector<8x256xf32>
    %c0_3 = arith.constant 0 : index
    %c0_4 = arith.constant 0 : index
    %4 = vector.load %arg3[%c0_3, %c0_4] : memref<8x256xf32, #tpu.memory_space<vmem>>, vector<8x256xf32>
    tpu.vector_store %arg3[%c0_3, %c0_4], %3 {strides = array<i32>} : memref<8x256xf32, #tpu.memory_space<vmem>>, vector<8x256xf32>,
    return
  }
  func.func @transform_0(%arg0: i32) -> (i32, i32) {
    %c0_i32 = arith.constant 0 : i32
    %c0_i32_0 = arith.constant 0 : i32
    return %arg0, %c0_i32 : i32, i32
  }
  func.func @transform_1(%arg0: i32) -> (i32, i32) {
    %c0_i32 = arith.constant 0 : i32
    %c0_i32_0 = arith.constant 0 : i32
    return %arg0, %c0_i32 : i32, i32
  }
  func.func @transform_2(%arg0: i32) -> (i32, i32) {
    %c0_i32 = arith.constant 0 : i32
    %c0_i32_0 = arith.constant 0 : i32
    return %arg0, %c0_i32 : i32, i32
  }
}

</mosaic_0001>

<bundles_post_ra>
// kernel: tpu_custom_call.1
= control target key start
LH: loop header
LB: loop body
LE: loop exit
PB: predicated region body
PF: predicated region fallthrough
CT: control target
= control target key end

     0   :  { %7 = vsyncpa [#allocation3], 0  ;;  %s148_s0 = inlined_call_operand.hbm [shape: f32[8,256], index: 0, kind: input, shape index: {}]   ;;  %s149_s1 = inlined_call_operand.vmem [shape: f32[8,1], index: 1, kind: input, shape index: {}]   ;;  %s150_s2 = inlined_call_operand.hbm [shape: f32[8,256], index: 2, kind: output, shape index: {}]  }
   0x1   :  { %8 = vsyncpa [#allocation4], 0  ;;  %s103_s9 = smov [#allocation2]   ;;  %s55_s13 = scalar_lea.hbm %s148_s0, 256 }
   0x2   :  { %s15_s10 = sshll.u32 %s103_s9, 4  ;;  %p56_p0 = scmp.ne.s32.totalorder %s148_s0, %s55_s13  ;;  %s16_s10 = int_to_ptr.vmem [resolvable:$true] %s15_s10 }
   0x3   :  { %p59_p1 = scmp.lt.u32.totalorder %s55_s13, %s148_s0 }
   0x5   :  { %p61_p2 = pnand %p59_p1, %p56_p0 }
   0x7   :  { %64 = shalt.err (!%p61_p2)
}
   0x8   :  { %s65_s18 = scalar_lea.vmem %s16_s10, 256  ;;  %p70_p4 = scmp.lt.s32.totalorder %s16_s10, %s16_s10 }
   0x9   :  { %p66_p3 = scmp.ne.s32.totalorder %s16_s10, %s65_s18  ;;  %p71_p5 = scmp.lt.s32.totalorder %s65_s18, %s65_s18 }
   0xb   :  { %p72_p6 = por %p71_p5, %p70_p4 }
   0xd   :  { %p73_p7 = pnand %p72_p6, %p66_p3 }
   0xf   :  { %76 = shalt.err (!%p73_p7)
}
  0x10   :  { %18 = dma.hbm_to_vmem [thread:$0]  %s148_s0, 256, %s16_s10, [#allocation3]  }
  0x11   :  { %99 = dma.done.wait [#allocation3], 256  }
  0x12   :  { %100 = vsyncadd [#allocation3], 4294967040  ;;  %v104_v0 = vmov 0   ;;  %v26_v1 = vld [vmem:[%s149_s1] sm:$0xff]  ;;  %v25_v3 = vld [vmem:[#allocation2 + $0x8] sm:$0xff]  ;;  %s105_s23 = smov [#allocation5]  }
  0x13   :  { %54 = vset.pattern.permute.xlu0 %v104_v0  ;;  %v24_v2 = vld [vmem:[#allocation2] sm:$0xff]  ;;  %s42_s24 = sshll.u32 %s105_s23, 4  ;;  %s43_s24 = int_to_ptr.vmem [resolvable:$true] %s42_s24 }
  0x14   :  { %29 = vperm.xlu0 %54, %v26_v1   ;;  %s77_s0 = scalar_lea.vmem %s43_s24, 256  ;;  %p82_p9 = scmp.lt.s32.totalorder %s43_s24, %s43_s24 }
  0x15   :  { %p78_p8 = scmp.ne.s32.totalorder %s43_s24, %s77_s0  ;;  %p83_p10 = scmp.lt.s32.totalorder %s77_s0, %s77_s0 }
  0x17   :  { %p84_p11 = por %p83_p10, %p82_p9 }
  0x19   :  { %p85_p12 = pnand %p84_p11, %p78_p8 }
  0x93   :  { %v30_v4 = vpop.permute.xlu0 %29 }
  0x94   :  { %v32_v5 = vmul.f32 %v30_v4, %v24_v2  ;;  %v33_v6 = vmul.f32 %v30_v4, %v25_v3 }
  0x96   :  { %34 = vst [vmem:[#allocation5] sm:$0xff] %v32_v5  ;;  %35 = vst [vmem:[#allocation5 + $0x8] sm:$0xff] %v33_v6 }
  0x97   :  { %88 = shalt.err (!%p85_p12)
}
  0x98   :  { %s89_s26 = scalar_lea.hbm %s150_s2, 256 }
  0x99   :  { %p90_p13 = scmp.ne.s32.totalorder %s150_s2, %s89_s26  ;;  %p93_p0 = scmp.lt.u32.totalorder %s89_s26, %s150_s2 }
  0x9b   :  { %p95_p1 = pnand %p93_p0, %p90_p13 }
  0x9d   :  { %98 = shalt.err (!%p95_p1)
}
  0x9e   :  { %45 = dma.vmem_to_hbm [thread:$0]  %s43_s24, 256, %s150_s2, [#allocation4]  }
  0x9f   :  { %101 = dma.done.wait [#allocation4], 256  }
  0xa0   :  { %102 = vsyncadd [#allocation4], 4294967040 }
  0xa1   :  { %49 = vsyncpa [#allocation3], 1 }
  0xa2   :  { %50 = vsyncpa [#allocation4], 1 }

</bundles_post_ra>
